<compile_context>
chip_gen: v6e
topology: v6e:2x2x1
jax: 0.10.0
libtpu: 0.0.40
codegen_flags: <defaults>
</compile_context>

<pallas_src>
import functools

import jax
import jax.numpy as jnp
from jax.experimental import pallas as pl
from jax.experimental.pallas import tpu as pltpu

LOG_STD_MAX = 2.0
LOG_STD_MIN = -20.0


def _softplus(x):
    # numerically stable softplus, lowers cleanly in Mosaic
    return jnp.maximum(x, 0.0) + jnp.log(1.0 + jnp.exp(-jnp.abs(x)))


def actor_kernel(obs_ref, w1_ref, b1_ref, w2_ref, b2_ref,
                 wmu_ref, bmu_ref, wls_ref, bls_ref, eps_ref,
                 act_ref, logp_ref, *, act_limit):
    obs = obs_ref[...]                                                # [TB, D]

    # Fused per-dim MLP: one matmul per layer instead of A tiny ones.
    h = jnp.dot(obs, w1_ref[...],
                preferred_element_type=jnp.float32) + b1_ref[...]     # [TB, A*H1]
    h = jnp.maximum(h, 0.0)                                           # ReLU
    h = jnp.dot(h, w2_ref[...],
                preferred_element_type=jnp.float32) + b2_ref[...]     # [TB, A*H2]
    h = jnp.maximum(h, 0.0)                                           # ReLU

    # Fused heads: block-structured [A*H2, A] weights => all A dims at once.
    mu = jnp.dot(h, wmu_ref[...],
                 preferred_element_type=jnp.float32) + bmu_ref[...]   # [TB, A]
    log_std = jnp.dot(h, wls_ref[...],
                      preferred_element_type=jnp.float32) + bls_ref[...]
    log_std = jnp.clip(log_std, LOG_STD_MIN, LOG_STD_MAX)
    std = jnp.exp(log_std)

    # rsample: pi = mu + std * eps
    eps = eps_ref[...]                                                # [TB, A]
    pi = mu + std * eps

    # Normal(mu, std).log_prob(pi) with ((pi-mu)/std)**2 == eps**2 (no divide),
    # minus the tanh-squash correction; sum over the action dims (lanes).
    logp_per = -0.5 * (eps * eps) - log_std - 0.5 * jnp.log(2.0 * jnp.pi)
    corr = 2.0 * (jnp.log(2.0) - pi - _softplus(-2.0 * pi))
    logp_ref[...] = jnp.sum(logp_per - corr, axis=1, keepdims=True)   # [TB, 1]

    act_ref[...] = act_limit * jnp.tanh(pi)                           # [TB, A]


def _block_diag(blocks):
    """[A, m, n] per-dim blocks -> [A*m, A*n] block-diagonal matrix."""
    A, m, n = blocks.shape
    eye = jnp.eye(A, dtype=blocks.dtype)
    return jnp.einsum('ij,imn->imjn', eye, blocks).reshape(A * m, A * n)


def fuse_params(params):
    """Stacked per-dim weights -> lane-aligned fused matrices for the kernel."""
    A, D, H1 = params['w1'].shape
    H2 = params['w2'].shape[2]
    w1f = jnp.transpose(params['w1'], (1, 0, 2)).reshape(D, A * H1)   # [D, A*H1]
    b1f = params['b1'].reshape(1, A * H1)
    w2f = _block_diag(params['w2'])                                   # [A*H1, A*H2]
    b2f = params['b2'].reshape(1, A * H2)
    wmuf = _block_diag(params['wmu'])                                 # [A*H2, A]
    bmuf = params['bmu'].reshape(1, A)
    wlsf = _block_diag(params['wls'])                                 # [A*H2, A]
    blsf = params['bls'].reshape(1, A)
    return w1f, b1f, w2f, b2f, wmuf, bmuf, wlsf, blsf


def decoupled_actor_forward(obs, params, eps, act_limit, batch_tile=512):
    """obs: [B, obs_dim], eps: [B, act_dim] standard-normal rsample noise.

    Returns (pi_action [B, act_dim], logp_pi [B]).
    """
    B, D = obs.shape
    A = params['w1'].shape[0]

    w1f, b1f, w2f, b2f, wmuf, bmuf, wlsf, blsf = fuse_params(params)

    # Batch tile: large for pipelining at training batch sizes, shrunk (and
    # sublane-aligned) for small batches. Batch is padded to a tile multiple.
    TB = batch_tile if B >= batch_tile else ((B + 7) // 8) * 8
    B_pad = pl.cdiv(B, TB) * TB
    if B_pad != B:
        obs = jnp.pad(obs, ((0, B_pad - B), (0, 0)))
        eps = jnp.pad(eps, ((0, B_pad - B), (0, 0)))

    kernel = functools.partial(actor_kernel, act_limit=float(act_limit))
    const = lambda i: (0, 0)   # weights resident across all batch tiles
    batch = lambda i: (i, 0)

    act, logp = pl.pallas_call(
        kernel,
        out_shape=(jax.ShapeDtypeStruct((B_pad, A), jnp.float32),
                   jax.ShapeDtypeStruct((B_pad, 1), jnp.float32)),
        grid=(B_pad // TB,),
        in_specs=[
            pl.BlockSpec((TB, D), batch),           # obs
            pl.BlockSpec(w1f.shape, const),
            pl.BlockSpec(b1f.shape, const),
            pl.BlockSpec(w2f.shape, const),
            pl.BlockSpec(b2f.shape, const),
            pl.BlockSpec(wmuf.shape, const),
            pl.BlockSpec(bmuf.shape, const),
            pl.BlockSpec(wlsf.shape, const),
            pl.BlockSpec(blsf.shape, const),
            pl.BlockSpec((TB, A), batch),           # eps
        ],
        out_specs=(pl.BlockSpec((TB, A), batch),    # action, [B, A] lane-major
                   pl.BlockSpec((TB, 1), batch)),   # logp
        compiler_params=pltpu.CompilerParams(
            dimension_semantics=("parallel",)),     # megacore batch sharding (v7x)
    )(obs, w1f, b1f, w2f, b2f, wmuf, bmuf, wlsf, blsf, eps)

    return act[:B], logp[:B, 0]


def reference_forward(obs, params, eps, act_limit):
    """Pure-JAX reference, mirrors the PyTorch module's per-dim forward loop."""
    A = params['w1'].shape[0]
    mus, lss = [], []
    for i in range(A):
        x = jnp.maximum(obs @ params['w1'][i] + params['b1'][i, 0], 0.0)
        x = jnp.maximum(x @ params['w2'][i] + params['b2'][i, 0], 0.0)
        mus.append(x @ params['wmu'][i] + params['bmu'][i, 0])        # [B, 1]
        lss.append(x @ params['wls'][i] + params['bls'][i, 0])        # [B, 1]
    mu = jnp.concatenate(mus, axis=1)                                 # [B, A]
    log_std = jnp.clip(jnp.concatenate(lss, axis=1), LOG_STD_MIN, LOG_STD_MAX)
    std = jnp.exp(log_std)
    pi = mu + std * eps
    logp = jnp.sum(-0.5 * ((pi - mu) / std) ** 2 - log_std
                   - 0.5 * jnp.log(2.0 * jnp.pi), axis=-1)
    logp = logp - jnp.sum(2.0 * (jnp.log(2.0) - pi - jax.nn.softplus(-2.0 * pi)),
                          axis=1)
    return act_limit * jnp.tanh(pi), logp


def init_params(key, obs_dim, act_dim, hidden_sizes):
    """Deterministic PyTorch-Linear-style init: U(-1/sqrt(fan_in), 1/sqrt(fan_in))."""
    h1, h2 = hidden_sizes
    ks = jax.random.split(key, 8)

    def u(k, shape, fan_in):
        lim = 1.0 / jnp.sqrt(float(fan_in))
        return jax.random.uniform(k, shape, jnp.float32, -lim, lim)

    return dict(
        w1=u(ks[0], (act_dim, obs_dim, h1), obs_dim),
        b1=u(ks[1], (act_dim, 1, h1), obs_dim),
        w2=u(ks[2], (act_dim, h1, h2), h1),
        b2=u(ks[3], (act_dim, 1, h2), h1),
        wmu=u(ks[4], (act_dim, h2, 1), h2),
        bmu=u(ks[5], (act_dim, 1, 1), h2),
        wls=u(ks[6], (act_dim, h2, 1), h2),
        bls=u(ks[7], (act_dim, 1, 1), h2),
    )


if __name__ == "__main__":
    obs_dim, act_dim = 8, 4
    hidden_sizes = (32, 32)
    act_limit = 1.0
    batch = 2

    key = jax.random.PRNGKey(0)
    k_params, k_obs, k_eps = jax.random.split(key, 3)

    params = init_params(k_params, obs_dim, act_dim, hidden_sizes)
    obs = jax.random.normal(k_obs, (batch, obs_dim), jnp.float32)
    eps = jax.random.normal(k_eps, (batch, act_dim), jnp.float32)  # rsample noise

    pi_action, logp_pi = decoupled_actor_forward(obs, params, eps, act_limit)
    pi_action, logp_pi = jax.block_until_ready((pi_action, logp_pi))

    ref_act, ref_logp = reference_forward(obs, params, eps, act_limit)
    assert pi_action.shape == (batch, act_dim)
    assert logp_pi.shape == (batch,)
    assert jnp.allclose(pi_action, ref_act, rtol=1e-3, atol=1e-3)
    assert jnp.allclose(logp_pi, ref_logp, rtol=1e-3, atol=1e-3)

    print("KERNEL_OK")
</pallas_src>

<mosaic_0001>
module attributes {stable_mosaic.version = 11 : i64} {
  func.func @actor_kernel(%arg0: i32, %arg1: memref<8x8xf32, #tpu.memory_space<vmem>>, %arg2: memref<8x128xf32, #tpu.memory_space<vmem>>, %arg3: memref<1x128xf32, #tpu.memory_space<vmem>>, %arg4: memref<128x128xf32, #tpu.memory_space<vmem>>, %arg5: memref<1x128xf32, #tpu.memory_space<vmem>>, %arg6: memref<128x4xf32, #tpu.memory_space<vmem>>, %arg7: memref<1x4xf32, #tpu.memory_space<vmem>>, %arg8: memref<128x4xf32, #tpu.memory_space<vmem>>, %arg9: memref<1x4xf32, #tpu.memory_space<vmem>>, %arg10: memref<8x4xf32, #tpu.memory_space<vmem>>, %arg11: memref<8x4xf32, #tpu.memory_space<vmem>>, %arg12: memref<8x1xf32, #tpu.memory_space<vmem>>) attributes {dimension_semantics = [#tpu.dimension_semantics<parallel>], iteration_bounds = array<i64: 1>, scalar_prefetch = 0 : i64, scratch_operands = 0 : i64, tpu.core_type = #tpu.core_type<tc>, window_params = [{transform_indices = @transform_0, window_bounds = array<i64: 8, 8>}, {pipeline_mode = #tpu.pipeline_mode<synchronous>, transform_indices = @transform_1, window_bounds = array<i64: 8, 128>}, {pipeline_mode = #tpu.pipeline_mode<synchronous>, transform_indices = @transform_2, window_bounds = array<i64: 1, 128>}, {pipeline_mode = #tpu.pipeline_mode<synchronous>, transform_indices = @transform_3, window_bounds = array<i64: 128, 128>}, {pipeline_mode = #tpu.pipeline_mode<synchronous>, transform_indices = @transform_4, window_bounds = array<i64: 1, 128>}, {pipeline_mode = #tpu.pipeline_mode<synchronous>, transform_indices = @transform_5, window_bounds = array<i64: 128, 4>}, {pipeline_mode = #tpu.pipeline_mode<synchronous>, transform_indices = @transform_6, window_bounds = array<i64: 1, 4>}, {pipeline_mode = #tpu.pipeline_mode<synchronous>, transform_indices = @transform_7, window_bounds = array<i64: 128, 4>}, {pipeline_mode = #tpu.pipeline_mode<synchronous>, transform_indices = @transform_8, window_bounds = array<i64: 1, 4>}, {transform_indices = @transform_9, window_bounds = array<i64: 8, 4>}, {transform_indices = @transform_10, window_bounds = array<i64: 8, 4>}, {transform_indices = @transform_11, window_bounds = array<i64: 8, 1>}]} {
    %c0 = arith.constant 0 : index
    %c0_0 = arith.constant 0 : index
    %0 = vector.load %arg1[%c0, %c0_0] : memref<8x8xf32, #tpu.memory_space<vmem>>, vector<8x8xf32>
    %c0_1 = arith.constant 0 : index
    %c0_2 = arith.constant 0 : index
    %1 = vector.load %arg2[%c0_1, %c0_2] : memref<8x128xf32, #tpu.memory_space<vmem>>, vector<8x128xf32>
    %cst = arith.constant dense<0.000000e+00> : vector<8x128xf32>
    %2 = tpu.matmul %0, %1, %cst {dimension_numbers = #tpu.dot_dimension_numbers<[1], [0], [0], [1], [0, 0, 1, 1], [], []>} : vector<8x8xf32>, vector<8x128xf32>, vector<8x128xf32> -> vector<8x128xf32>
    %c0_3 = arith.constant 0 : index
    %c0_4 = arith.constant 0 : index
    %3 = vector.load %arg3[%c0_3, %c0_4] : memref<1x128xf32, #tpu.memory_space<vmem>>, vector<1x128xf32>
    %4 = vector.broadcast %3 : vector<1x128xf32> to vector<8x128xf32>
    %5 = arith.addf %2, %4 : vector<8x128xf32>
    %cst_5 = arith.constant 0.000000e+00 : f32
    %6 = vector.broadcast %cst_5 : f32 to vector<8x128xf32>
    %7 = arith.maximumf %5, %6 : vector<8x128xf32>
    %c0_6 = arith.constant 0 : index
    %c0_7 = arith.constant 0 : index
    %8 = vector.load %arg4[%c0_6, %c0_7] : memref<128x128xf32, #tpu.memory_space<vmem>>, vector<128x128xf32>
    %cst_8 = arith.constant dense<0.000000e+00> : vector<8x128xf32>
    %9 = tpu.matmul %7, %8, %cst_8 {dimension_numbers = #tpu.dot_dimension_numbers<[1], [0], [0], [1], [0, 0, 1, 1], [], []>} : vector<8x128xf32>, vector<128x128xf32>, vector<8x128xf32> -> vector<8x128xf32>
    %c0_9 = arith.constant 0 : index
    %c0_10 = arith.constant 0 : index
    %10 = vector.load %arg5[%c0_9, %c0_10] : memref<1x128xf32, #tpu.memory_space<vmem>>, vector<1x128xf32>
    %11 = vector.broadcast %10 : vector<1x128xf32> to vector<8x128xf32>
    %12 = arith.addf %9, %11 : vector<8x128xf32>
    %cst_11 = arith.constant 0.000000e+00 : f32
    %13 = vector.broadcast %cst_11 : f32 to vector<8x128xf32>
    %14 = arith.maximumf %12, %13 : vector<8x128xf32>
    %c0_12 = arith.constant 0 : index
    %c0_13 = arith.constant 0 : index
    %15 = vector.load %arg6[%c0_12, %c0_13] : memref<128x4xf32, #tpu.memory_space<vmem>>, vector<128x4xf32>
    %cst_14 = arith.constant dense<0.000000e+00> : vector<8x4xf32>
    %16 = tpu.matmul %14, %15, %cst_14 {dimension_numbers = #tpu.dot_dimension_numbers<[1], [0], [0], [1], [0, 0, 1, 1], [], []>} : vector<8x128xf32>, vector<128x4xf32>, vector<8x4xf32> -> vector<8x4xf32>
    %c0_15 = arith.constant 0 : index
    %c0_16 = arith.constant 0 : index
    %17 = vector.load %arg7[%c0_15, %c0_16] : memref<1x4xf32, #tpu.memory_space<vmem>>, vector<1x4xf32>
    %18 = vector.broadcast %17 : vector<1x4xf32> to vector<8x4xf32>
    %19 = arith.addf %16, %18 : vector<8x4xf32>
    %c0_17 = arith.constant 0 : index
    %c0_18 = arith.constant 0 : index
    %20 = vector.load %arg8[%c0_17, %c0_18] : memref<128x4xf32, #tpu.memory_space<vmem>>, vector<128x4xf32>
    %cst_19 = arith.constant dense<0.000000e+00> : vector<8x4xf32>
    %21 = tpu.matmul %14, %20, %cst_19 {dimension_numbers = #tpu.dot_dimension_numbers<[1], [0], [0], [1], [0, 0, 1, 1], [], []>} : vector<8x128xf32>, vector<128x4xf32>, vector<8x4xf32> -> vector<8x4xf32>
    %c0_20 = arith.constant 0 : index
    %c0_21 = arith.constant 0 : index
    %22 = vector.load %arg9[%c0_20, %c0_21] : memref<1x4xf32, #tpu.memory_space<vmem>>, vector<1x4xf32>
    %23 = vector.broadcast %22 : vector<1x4xf32> to vector<8x4xf32>
    %24 = arith.addf %21, %23 : vector<8x4xf32>
    %cst_22 = arith.constant -2.000000e+01 : f32
    %cst_23 = arith.constant 2.000000e+00 : f32
    %25 = vector.broadcast %cst_22 : f32 to vector<8x4xf32>
    %26 = arith.maximumf %25, %24 : vector<8x4xf32>
    %27 = vector.broadcast %cst_23 : f32 to vector<8x4xf32>
    %28 = arith.minimumf %27, %26 : vector<8x4xf32>
    %29 = math.exp %28 : vector<8x4xf32>
    %c0_24 = arith.constant 0 : index
    %c0_25 = arith.constant 0 : index
    %30 = vector.load %arg10[%c0_24, %c0_25] : memref<8x4xf32, #tpu.memory_space<vmem>>, vector<8x4xf32>
    %31 = arith.mulf %29, %30 : vector<8x4xf32>
    %32 = arith.addf %19, %31 : vector<8x4xf32>
    %33 = arith.mulf %30, %30 : vector<8x4xf32>
    %cst_26 = arith.constant -5.000000e-01 : f32
    %34 = vector.broadcast %cst_26 : f32 to vector<8x4xf32>
    %35 = arith.mulf %34, %33 : vector<8x4xf32>
    %36 = arith.subf %35, %28 : vector<8x4xf32>
    %cst_27 = arith.constant 6.28318548 : f32
    %37 = math.log %cst_27 : f32
    %cst_28 = arith.constant 5.000000e-01 : f32
    %38 = arith.mulf %cst_28, %37 : f32
    %39 = vector.broadcast %38 : f32 to vector<8x4xf32>
    %40 = arith.subf %36, %39 : vector<8x4xf32>
    %cst_29 = arith.constant 2.000000e+00 : f32
    %41 = math.log %cst_29 : f32
    %42 = vector.broadcast %41 : f32 to vector<8x4xf32>
    %43 = arith.subf %42, %32 : vector<8x4xf32>
    %cst_30 = arith.constant -2.000000e+00 : f32
    %44 = vector.broadcast %cst_30 : f32 to vector<8x4xf32>
    %45 = arith.mulf %44, %32 : vector<8x4xf32>
    %cst_31 = arith.constant 0.000000e+00 : f32
    %46 = vector.broadcast %cst_31 : f32 to vector<8x4xf32>
    %47 = arith.maximumf %45, %46 : vector<8x4xf32>
    %48 = math.absf %45 : vector<8x4xf32>
    %cst_32 = arith.constant 0.000000e+00 : f32
    %49 = vector.broadcast %cst_32 : f32 to vector<8x4xf32>
    %50 = arith.subf %49, %48 : vector<8x4xf32>
    %51 = math.exp %50 : vector<8x4xf32>
    %cst_33 = arith.constant 1.000000e+00 : f32
    %52 = vector.broadcast %cst_33 : f32 to vector<8x4xf32>
    %53 = arith.addf %52, %51 : vector<8x4xf32>
    %54 = math.log %53 : vector<8x4xf32>
    %55 = arith.addf %47, %54 : vector<8x4xf32>
    %56 = arith.subf %43, %55 : vector<8x4xf32>
    %cst_34 = arith.constant 2.000000e+00 : f32
    %57 = vector.broadcast %cst_34 : f32 to vector<8x4xf32>
    %58 = arith.mulf %57, %56 : vector<8x4xf32>
    %59 = arith.subf %40, %58 : vector<8x4xf32>
    %cst_35 = arith.constant dense<0.000000e+00> : vector<8xf32>
    %60 = vector.multi_reduction <add>, %59, %cst_35 [1] : vector<8x4xf32> to vector<8xf32>
    %61 = vector.shape_cast %60 : vector<8xf32> to vector<8x1xf32>
    %c0_36 = arith.constant 0 : index
    %c0_37 = arith.constant 0 : index
    %62 = vector.load %arg12[%c0_36, %c0_37] : memref<8x1xf32, #tpu.memory_space<vmem>>, vector<8x1xf32>
    tpu.vector_store %arg12[%c0_36, %c0_37], %61 {strides = array<i32>} : memref<8x1xf32, #tpu.memory_space<vmem>>, vector<8x1xf32>,
    %63 = math.tanh %32 : vector<8x4xf32>
    %cst_38 = arith.constant 1.000000e+00 : f32
    %64 = vector.broadcast %cst_38 : f32 to vector<8x4xf32>
    %65 = arith.mulf %64, %63 : vector<8x4xf32>
    %c0_39 = arith.constant 0 : index
    %c0_40 = arith.constant 0 : index
    %66 = vector.load %arg11[%c0_39, %c0_40] : memref<8x4xf32, #tpu.memory_space<vmem>>, vector<8x4xf32>
    tpu.vector_store %arg11[%c0_39, %c0_40], %65 {strides = array<i32>} : memref<8x4xf32, #tpu.memory_space<vmem>>, vector<8x4xf32>,
    return
  }
  func.func @transform_0(%arg0: i32) -> (i32, i32) {
    %c0_i32 = arith.constant 0 : i32
    %c0_i32_0 = arith.constant 0 : i32
    return %arg0, %c0_i32 : i32, i32
  }
  func.func @transform_1(%arg0: i32) -> (i32, i32) {
    %c0_i32 = arith.constant 0 : i32
    %c0_i32_0 = arith.constant 0 : i32
    %c0_i32_1 = arith.constant 0 : i32
    return %c0_i32, %c0_i32_0 : i32, i32
  }
  func.func @transform_2(%arg0: i32) -> (i32, i32) {
    %c0_i32 = arith.constant 0 : i32
    %c0_i32_0 = arith.constant 0 : i32
    %c0_i32_1 = arith.constant 0 : i32
    return %c0_i32, %c0_i32_0 : i32, i32
  }
  func.func @transform_3(%arg0: i32) -> (i32, i32) {
    %c0_i32 = arith.constant 0 : i32
    %c0_i32_0 = arith.constant 0 : i32
    %c0_i32_1 = arith.constant 0 : i32
    return %c0_i32, %c0_i32_0 : i32, i32
  }
  func.func @transform_4(%arg0: i32) -> (i32, i32) {
    %c0_i32 = arith.constant 0 : i32
    %c0_i32_0 = arith.constant 0 : i32
    %c0_i32_1 = arith.constant 0 : i32
    return %c0_i32, %c0_i32_0 : i32, i32
  }
  func.func @transform_5(%arg0: i32) -> (i32, i32) {
    %c0_i32 = arith.constant 0 : i32
    %c0_i32_0 = arith.constant 0 : i32
    %c0_i32_1 = arith.constant 0 : i32
    return %c0_i32, %c0_i32_0 : i32, i32
  }
  func.func @transform_6(%arg0: i32) -> (i32, i32) {
    %c0_i32 = arith.constant 0 : i32
    %c0_i32_0 = arith.constant 0 : i32
    %c0_i32_1 = arith.constant 0 : i32
    return %c0_i32, %c0_i32_0 : i32, i32
  }
  func.func @transform_7(%arg0: i32) -> (i32, i32) {
    %c0_i32 = arith.constant 0 : i32
    %c0_i32_0 = arith.constant 0 : i32
    %c0_i32_1 = arith.constant 0 : i32
    return %c0_i32, %c0_i32_0 : i32, i32
  }
  func.func @transform_8(%arg0: i32) -> (i32, i32) {
    %c0_i32 = arith.constant 0 : i32
    %c0_i32_0 = arith.constant 0 : i32
    %c0_i32_1 = arith.constant 0 : i32
    return %c0_i32, %c0_i32_0 : i32, i32
  }
  func.func @transform_9(%arg0: i32) -> (i32, i32) {
    %c0_i32 = arith.constant 0 : i32
    %c0_i32_0 = arith.constant 0 : i32
    return %arg0, %c0_i32 : i32, i32
  }
  func.func @transform_10(%arg0: i32) -> (i32, i32) {
    %c0_i32 = arith.constant 0 : i32
    %c0_i32_0 = arith.constant 0 : i32
    return %arg0, %c0_i32 : i32, i32
  }
  func.func @transform_11(%arg0: i32) -> (i32, i32) {
    %c0_i32 = arith.constant 0 : i32
    %c0_i32_0 = arith.constant 0 : i32
    return %arg0, %c0_i32 : i32, i32
  }
}

</mosaic_0001>

<bundles_post_ra>
// kernel: tpu_custom_call.1
= control target key start
LH: loop header
LB: loop body
LE: loop exit
PB: predicated region body
PF: predicated region fallthrough
CT: control target
= control target key end

     0   :  { %vm46_vm0 = vcmask 64512   ;;  %v621_v0 = vmov 0.0   ;;  %vm622_vm1 = vmmov 0   ;;  %vm426_vm2 = vcmask 31744   ;;  %s913_s1 = inlined_call_operand.vmem [shape: f32[8,128], index: 1, kind: input, shape index: {}]   ;;  %s914_s0 = inlined_call_operand.vmem [shape: f32[8,8], index: 0, kind: input, shape index: {}]   ;;  %s915_s3 = inlined_call_operand.vmem [shape: f32[128,128], index: 3, kind: input, shape index: {}]   ;;  %s916_s5 = inlined_call_operand.vmem [shape: f32[128,4], index: 5, kind: input, shape index: {}]   ;;  %s917_s2 = inlined_call_operand.vmem [shape: f32[1,128], index: 2, kind: input, shape index: {}]   ;;  %s918_s7 = inlined_call_operand.vmem [shape: f32[128,4], index: 7, kind: input, shape index: {}]   ;;  %s919_s4 = inlined_call_operand.vmem [shape: f32[1,128], index: 4, kind: input, shape index: {}]   ;;  %s920_s8 = inlined_call_operand.vmem [shape: f32[1,4], index: 8, kind: input, shape index: {}]   ;;  %s921_s6 = inlined_call_operand.vmem [shape: f32[1,4], index: 6, kind: input, shape index: {}]   ;;  %s922_s9 = inlined_call_operand.vmem [shape: f32[8,4], index: 9, kind: input, shape index: {}]   ;;  %s923_s10 = inlined_call_operand.vmem [shape: f32[8,4], index: 10, kind: output, shape index: {0}]   ;;  %s924_s11 = inlined_call_operand.vmem [shape: f32[8,1], index: 11, kind: output, shape index: {1}]  }
   0x1   :  { %501 = vmatprep.subr.mxu0 %v621_v0  ;;  %v38_v1 = vld [vmem:[%s913_s1] sm:$0xff]  ;;  %503 = vmatprep.mubr.msk.f32.mxu0 %vm622_vm1, %v621_v0  ;;  %v136_v3 = vld [vmem:[%s915_s3 + $0x78] sm:$0xff]  ;;  %v135_v4 = vld [vmem:[%s915_s3 + $0x70] sm:$0xff]  ;;  %vm430_vm3 = vcmask 7168  }
   0x2   :  { %v37_v2 = vld [vmem:[%s914_s0] sm:$0xff]  ;;  %502 = vmatpush3.msra.mxu0 %v38_v1  ;;  %506 = vmatprep.subr.mxu1 %v621_v0  ;;  %v134_v5 = vld [vmem:[%s915_s3 + $0x68] sm:$0xff]  ;;  %v132_v7 = vld [vmem:[%s915_s3 + $0x58] sm:$0xff] }
   0x3   :  { %504 = vmatmul.mubr.msk.f32.vlgmr.msra.gmra.mxu0 %vm46_vm0, %v37_v2  ;;  %507 = vmatpush3.msra.mxu1 %v136_v3  ;;  %v133_v6 = vld [vmem:[%s915_s3 + $0x60] sm:$0xff]  ;;  %v131_v8 = vld [vmem:[%s915_s3 + $0x50] sm:$0xff]  ;;  %v130_v9 = vld [vmem:[%s915_s3 + $0x48] sm:$0xff] }
   0x4   :  { %508 = vmatprep.subr.mxu1 %v621_v0  ;;  %538 = vmatprep.mubr.msk.f32.mxu1 %vm622_vm1, %v621_v0  ;;  %v129_v10 = vld [vmem:[%s915_s3 + $0x40] sm:$0xff]  ;;  %v128_v11 = vld [vmem:[%s915_s3 + $0x38] sm:$0xff]  ;;  %v127_v12 = vld [vmem:[%s915_s3 + $0x30] sm:$0xff] }
   0x5   :  { %509 = vmatpush3.msra.mxu1 %v135_v4  ;;  %541 = vmatprep.subr.mxu0 %v621_v0  ;;  %v126_v13 = vld [vmem:[%s915_s3 + $0x28] sm:$0xff]  ;;  %v125_v14 = vld [vmem:[%s915_s3 + $0x20] sm:$0xff]  ;;  %v124_v15 = vld [vmem:[%s915_s3 + $0x18] sm:$0xff] }
   0x6   :  { %510 = vmatprep.subr.mxu1 %v621_v0  ;;  %573 = vmatprep.mubr.msk.f32.mxu0 %vm622_vm1, %v621_v0  ;;  %v123_v16 = vld [vmem:[%s915_s3 + $0x10] sm:$0xff]  ;;  %v122_v17 = vld [vmem:[%s915_s3 + $0x8] sm:$0xff]  ;;  %v121_v18 = vld [vmem:[%s915_s3] sm:$0xff] }
   0x7   :  { %511 = vmatpush3.msra.mxu1 %v134_v5  ;;  %v230_v19 = vld [vmem:[%s916_s5 + $0x78] sm:$0xff]  ;;  %v229_v20 = vld [vmem:[%s916_s5 + $0x70] sm:$0xff]  ;;  %v228_v21 = vld [vmem:[%s916_s5 + $0x68] sm:$0xff] }
   0x8   :  { %512 = vmatprep.subr.mxu1 %v621_v0  ;;  %542 = vmatpush3.msra.mxu0 %v230_v19  ;;  %v227_v22 = vld [vmem:[%s916_s5 + $0x60] sm:$0xff]  ;;  %v226_v23 = vld [vmem:[%s916_s5 + $0x58] sm:$0xff]  ;;  %v225_v24 = vld [vmem:[%s916_s5 + $0x50] sm:$0xff] }
   0x9   :  { %513 = vmatpush3.msra.mxu1 %v133_v6  ;;  %543 = vmatprep.subr.mxu0 %v621_v0  ;;  %v224_v25 = vld [vmem:[%s916_s5 + $0x48] sm:$0xff]  ;;  %v223_v26 = vld [vmem:[%s916_s5 + $0x40] sm:$0xff]  ;;  %v222_v27 = vld [vmem:[%s916_s5 + $0x38] sm:$0xff] }
   0xa   :  { %514 = vmatprep.subr.mxu1 %v621_v0  ;;  %544 = vmatpush3.msra.mxu0 %v229_v20  ;;  %v221_v28 = vld [vmem:[%s916_s5 + $0x30] sm:$0xff]  ;;  %v220_v29 = vld [vmem:[%s916_s5 + $0x28] sm:$0xff]  ;;  %v219_v30 = vld [vmem:[%s916_s5 + $0x20] sm:$0xff] }
   0xb   :  { %515 = vmatpush3.msra.mxu1 %v132_v7  ;;  %545 = vmatprep.subr.mxu0 %v621_v0  ;;  %v218_v31 = vld [vmem:[%s916_s5 + $0x18] sm:$0xff]  ;;  %v442_v32 = vld [vmem:[%s917_s2] ss:$0 sm:$0xff]  ;;  %v322_v38 = vld [vmem:[%s918_s7 + $0x70] sm:$0xff] }
   0xc   :  { %516 = vmatprep.subr.mxu1 %v621_v0  ;;  %546 = vmatpush3.msra.mxu0 %v228_v21  ;;  %v323_v37 = vld [vmem:[%s918_s7 + $0x78] sm:$0xff]  ;;  %v321_v39 = vld [vmem:[%s918_s7 + $0x68] sm:$0xff]  ;;  %v320_v40 = vld [vmem:[%s918_s7 + $0x60] sm:$0xff] }
   0xd   :  { %517 = vmatpush3.msra.mxu1 %v131_v8  ;;  %547 = vmatprep.subr.mxu0 %v621_v0  ;;  %v319_v41 = vld [vmem:[%s918_s7 + $0x58] sm:$0xff]  ;;  %v318_v42 = vld [vmem:[%s918_s7 + $0x50] sm:$0xff]  ;;  %v317_v43 = vld [vmem:[%s918_s7 + $0x48] sm:$0xff] }
   0xe   :  { %518 = vmatprep.subr.mxu1 %v621_v0  ;;  %548 = vmatpush3.msra.mxu0 %v227_v22  ;;  %v316_v44 = vld [vmem:[%s918_s7 + $0x40] sm:$0xff]  ;;  %v315_v45 = vld [vmem:[%s918_s7 + $0x38] sm:$0xff]  ;;  %v314_v46 = vld [vmem:[%s918_s7 + $0x30] sm:$0xff] }
   0xf   :  { %519 = vmatpush3.msra.mxu1 %v130_v9  ;;  %549 = vmatprep.subr.mxu0 %v621_v0  ;;  %v313_v47 = vld [vmem:[%s918_s7 + $0x28] sm:$0xff]  ;;  %v312_v48 = vld [vmem:[%s918_s7 + $0x20] sm:$0xff]  ;;  %v311_v49 = vld [vmem:[%s918_s7 + $0x18] sm:$0xff] }
  0x10   :  { %520 = vmatprep.subr.mxu1 %v621_v0  ;;  %550 = vmatpush3.msra.mxu0 %v226_v23  ;;  %v217_v50 = vld [vmem:[%s916_s5 + $0x10] sm:$0xff]  ;;  %v216_v52 = vld [vmem:[%s916_s5 + $0x8] sm:$0xff]  ;;  %v215_v54 = vld [vmem:[%s916_s5] sm:$0xff] }
  0x11   :  { %521 = vmatpush3.msra.mxu1 %v129_v10  ;;  %551 = vmatprep.subr.mxu0 %v621_v0  ;;  %v310_v51 = vld [vmem:[%s918_s7 + $0x10] sm:$0xff]  ;;  %v309_v53 = vld [vmem:[%s918_s7 + $0x8] sm:$0xff]  ;;  %v308_v55 = vld [vmem:[%s918_s7] sm:$0xff] }
  0x12   :  { %522 = vmatprep.subr.mxu1 %v621_v0  ;;  %552 = vmatpush3.msra.mxu0 %v225_v24  ;;  %v444_v56 = vld [vmem:[%s919_s4] ss:$0 sm:$0xff] }
  0x13   :  { %523 = vmatpush3.msra.mxu1 %v128_v11  ;;  %553 = vmatprep.subr.mxu0 %v621_v0  ;;  %v446_v61 = vld [vmem:[%s920_s8] ss:$0 sm:$0xff] }
  0x14   :  { %524 = vmatprep.subr.mxu1 %v621_v0  ;;  %554 = vmatpush3.msra.mxu0 %v224_v25  ;;  %v445_v6 = vld [vmem:[%s921_s6] ss:$0 sm:$0xff] }
  0x15   :  { %525 = vmatpush3.msra.mxu1 %v127_v12  ;;  %555 = vmatprep.subr.mxu0 %v621_v0  ;;  %v405_v8 = vld [vmem:[%s922_s9] sm:$0xff] }
  0x16   :  { %526 = vmatprep.subr.mxu1 %v621_v0  ;;  %556 = vmatpush3.msra.mxu0 %v223_v26  ;;  %v408_v19 = vmul.f32 %v405_v8, %v405_v8 }
  0x17   :  { %527 = vmatpush3.msra.mxu1 %v126_v13  ;;  %557 = vmatprep.subr.mxu0 %v621_v0 }
  0x18   :  { %528 = vmatprep.subr.mxu1 %v621_v0  ;;  %558 = vmatpush3.msra.mxu0 %v222_v27  ;;  %v409_v20 = vmul.f32 -0.5, %v408_v19 }
  0x19   :  { %529 = vmatpush3.msra.mxu1 %v125_v14  ;;  %559 = vmatprep.subr.mxu0 %v621_v0 }
  0x1a   :  { %530 = vmatprep.subr.mxu1 %v621_v0  ;;  %560 = vmatpush3.msra.mxu0 %v221_v28 }
  0x1b   :  { %531 = vmatpush3.msra.mxu1 %v124_v15  ;;  %561 = vmatprep.subr.mxu0 %v621_v0 }
  0x1c   :  { %532 = vmatprep.subr.mxu1 %v621_v0  ;;  %562 = vmatpush3.msra.mxu0 %v220_v29 }
  0x1d   :  { %533 = vmatpush3.msra.mxu1 %v123_v16  ;;  %563 = vmatprep.subr.mxu0 %v621_v0 }
  0x1e   :  { %534 = vmatprep.subr.mxu1 %v621_v0  ;;  %564 = vmatpush3.msra.mxu0 %v219_v30 }
  0x1f   :  { %535 = vmatpush3.msra.mxu1 %v122_v17  ;;  %565 = vmatprep.subr.mxu0 %v621_v0 }
  0x20   :  { %536 = vmatprep.subr.mxu1 %v621_v0  ;;  %566 = vmatpush3.msra.mxu0 %v218_v31 }
  0x21   :  { %537 = vmatpush3.msra.mxu1 %v121_v18  ;;  %567 = vmatprep.subr.mxu0 %v621_v0 }
  0x22   :  { %576 = vmatprep.subr.mxu1 %v621_v0  ;;  %568 = vmatpush3.msra.mxu0 %v217_v50 }
  0x23   :  { %569 = vmatprep.subr.mxu0 %v621_v0 }
  0x24   :  { %570 = vmatpush3.msra.mxu0 %v216_v52 }
  0x25   :  { %571 = vmatprep.subr.mxu0 %v621_v0 }
  0x26   :  { %572 = vmatpush3.msra.mxu0 %v215_v54 }
  0xc3   :  { %v116_v33 = vpop.f32.mrf.mxu0 }
  0xc4   :  { %v117_v34 = vadd.f32 %v442_v32, %v116_v33 }
  0xc5   :  { %v505_v35 = vpop.f32.mrf.mxu0 }
  0xc6   :  { %v120_v36 = vmax.f32 %v117_v34, 0.0 }
  0xc8   :  { %539 = vmatmul.mubr.f32.vlgmr.msra.gmra.mxu1 %v120_v36 }
  0xc9   :  { %577 = vmatpush3.msra.mxu1 %v323_v37  ;;  %608 = vmatprep.mubr.msk.f32.mxu1 %vm622_vm1, %v621_v0 }
  0xca   :  { %578 = vmatprep.subr.mxu1 %v621_v0 }
  0xcb   :  { %579 = vmatpush3.msra.mxu1 %v322_v38 }
  0xcc   :  { %580 = vmatprep.subr.mxu1 %v621_v0 }
  0xcd   :  { %581 = vmatpush3.msra.mxu1 %v321_v39 }
  0xce   :  { %582 = vmatprep.subr.mxu1 %v621_v0 }
  0xcf   :  { %583 = vmatpush3.msra.mxu1 %v320_v40 }
  0xd0   :  { %584 = vmatprep.subr.mxu1 %v621_v0 }
  0xd1   :  { %585 = vmatpush3.msra.mxu1 %v319_v41 }
  0xd2   :  { %586 = vmatprep.subr.mxu1 %v621_v0 }
  0xd3   :  { %587 = vmatpush3.msra.mxu1 %v318_v42 }
  0xd4   :  { %588 = vmatprep.subr.mxu1 %v621_v0 }
  0xd5   :  { %589 = vmatpush3.msra.mxu1 %v317_v43 }
  0xd6   :  { %590 = vmatprep.subr.mxu1 %v621_v0 }
  0xd7   :  { %591 = vmatpush3.msra.mxu1 %v316_v44 }
  0xd8   :  { %592 = vmatprep.subr.mxu1 %v621_v0 }
  0xd9   :  { %593 = vmatpush3.msra.mxu1 %v315_v45 }
  0xda   :  { %594 = vmatprep.subr.mxu1 %v621_v0 }
  0xdb   :  { %595 = vmatpush3.msra.mxu1 %v314_v46 }
  0xdc   :  { %596 = vmatprep.subr.mxu1 %v621_v0 }
  0xdd   :  { %597 = vmatpush3.msra.mxu1 %v313_v47 }
  0xde   :  { %598 = vmatprep.subr.mxu1 %v621_v0 }
  0xdf   :  { %599 = vmatpush3.msra.mxu1 %v312_v48 }
  0xe0   :  { %600 = vmatprep.subr.mxu1 %v621_v0 }
  0xe1   :  { %601 = vmatpush3.msra.mxu1 %v311_v49 }
  0xe2   :  { %602 = vmatprep.subr.mxu1 %v621_v0 }
  0xe3   :  { %603 = vmatpush3.msra.mxu1 %v310_v51 }
  0xe4   :  { %604 = vmatprep.subr.mxu1 %v621_v0 }
  0xe5   :  { %605 = vmatpush3.msra.mxu1 %v309_v53 }
  0xe6   :  { %606 = vmatprep.subr.mxu1 %v621_v0 }
  0xe7   :  { %607 = vmatpush3.msra.mxu1 %v308_v55 }
 0x188   :  { %v210_v57 = vpop.f32.mrf.mxu1 }
 0x189   :  { %v211_v58 = vadd.f32 %v444_v56, %v210_v57 }
 0x18a   :  { %v540_v59 = vpop.f32.mrf.mxu1 }
 0x18b   :  { %v214_v60 = vmax.f32 %v211_v58, 0.0 }
 0x18d   :  { %574 = vmatmul.mubr.f32.vlgmr.msra.gmra.mxu0 %v214_v60  ;;  %609 = vmatmul.mubr.f32.vlgmr.msra.gmra.mxu1 %v214_v60 }
 0x24d   :  { %v304_v62 = vpop.f32.mrf.mxu0  ;;  %v397_v63 = vpop.f32.mrf.mxu1 }
 0x24e   :  { %v398_v0 = vadd.f32 %v446_v61, %v397_v63  ;;  %v305_v9 = vadd.f32 %v445_v6, %v304_v62 }
 0x24f   :  { %v575_v1 = vpop.f32.mrf.mxu0  ;;  %v610_v2 = vpop.f32.mrf.mxu1 }
 0x250   :  { %v401_v3 = vmax.f32 %v398_v0, -20.0 }
 0x252   :  { %v402_v4 = vmin.f32 %v401_v3, 2.0 }
 0x254   :  { %v403_v5 = vmul.f32 1.442695, %v402_v4  ;;  %v410_v24 = vsub.f32 %v409_v20, %v402_v4 }
 0x256   :  { %613 = vpow2.f32 %v403_v5  ;;  %v447_v28 = vadd.f32 -0.9189385, %v410_v24 }
 0x263   :  { %v614_v7 = vpop.eup %613 }
 0x264   :  { %v406_v10 = vmul.f32 %v614_v7, %v405_v8 }
 0x266   :  { %v407_v11 = vadd.f32 %v406_v10, %v305_v9 }
 0x268   :  { %615 = vtanh.f32 %v407_v11  ;;  %v413_v12 = vmul.f32 -2.0, %v407_v11  ;;  %v412_v25 = vsub.f32 0.6931472, %v407_v11 }
 0x26a   :  { %v415_v13 = vand.u32 2147483647, %v413_v12  ;;  %v414_v22 = vmax.f32 %v413_v12, 0.0 }
 0x26c   :  { %v416_v14 = vsub.f32 0.0, %v415_v13 }
 0x26e   :  { %v417_v15 = vmul.f32 1.442695, %v416_v14 }
 0x270   :  { %617 = vpow2.f32 %v417_v15 }
 0x275   :  { %v616_v16 = vpop.eup %615 }
 0x276   :  { %433 = vst.msk [vmem:[%s923_s10] sm:$0xff] %vm426_vm2, %v616_v16 }
 0x27d   :  { %v618_v17 = vpop.eup %617 }
 0x27e   :  { %v419_v18 = vadd.f32 1.0, %v618_v17 }
 0x280   :  { %619 = vlog2.f32 %v419_v18 }
 0x28d   :  { %v620_v21 = vpop.eup %619 }
 0x28e   :  { %v421_v23 = vmul.f32 0.6931472, %v620_v21 }
 0x290   :  { %v422_v26 = vadd.f32 %v421_v23, %v414_v22 }
 0x292   :  { %v423_v27 = vsub.f32 %v412_v25, %v422_v26 }
 0x294   :  { %v424_v29 = vmul.f32 2.0, %v423_v27 }
 0x296   :  { %v425_v30 = vsub.f32 %v447_v28, %v424_v29 }
 0x298   :  { %v427_v31 = vsel %vm426_vm2, %v425_v30, 0.0 }
 0x299   :  { %428 = vadd.xlane.f32.xlu0 %v427_v31 }
 0x322   :  { %v429_v32 = vpop.xlane.xlu0 %428 }
 0x323   :  { %431 = vst.msk [vmem:[%s924_s11] sm:$0xff] %vm430_vm3, %v429_v32 }

</bundles_post_ra>
